<compile_context>
chip_gen: v6e
topology: v6e:2x2x1
jax: 0.10.0
libtpu: 0.0.40
codegen_flags: <defaults>
</compile_context>

<pallas_src>
import functools

import jax
import jax.numpy as jnp
from jax.experimental import pallas as pl
from jax.experimental.pallas import tpu as pltpu


def _svm_kernel(x_ref, w_ref, b_ref, o_ref, acc_ref, *, n_features, block_k):
    k = pl.program_id(1)
    nk = pl.num_programs(1)

    x = x_ref[...]                      # (tm, block_k), native dtype
    w = w_ref[...]                      # (1, block_k), broadcast over rows (VPU)
    xw = x * w                          # f32 (promotion) elementwise product

    if n_features % block_k != 0:
        # Ragged last reduction block: edge-block reads are undefined garbage
        # (wrapper does NOT pad x or w), so zero the invalid columns of the
        # product (jnp.where also kills any NaN garbage).
        col = k * block_k + jax.lax.broadcasted_iota(jnp.int32, xw.shape, 1)
        xw = jnp.where(col < n_features, xw, 0.0)

    if block_k % 128 == 0:
        # Per-lane partial sums: fold block_k lanes down to 128 with VPU adds
        # only; one cross-lane reduce on the final k step.
        @pl.when(k == 0)
        def _():
            acc_ref[...] = jnp.zeros_like(acc_ref)

        acc = acc_ref[...]
        for c in range(block_k // 128):
            acc = acc + xw[:, c * 128:(c + 1) * 128]
        acc_ref[...] = acc

        @pl.when(k == nk - 1)
        def _():
            o_ref[...] = (jnp.sum(acc_ref[...], axis=1, keepdims=True)
                          + b_ref[0]).astype(o_ref.dtype)
    else:
        # Only reachable when block_k == n_features (single reduction step):
        # reduce directly, no accumulator needed.
        o_ref[...] = (jnp.sum(xw, axis=1, keepdims=True)
                      + b_ref[0]).astype(o_ref.dtype)


def svm_forward(x, weight, bias, *, tm=512, tk=4096):
    """Forward of SVM: y = x @ weight.T + bias.

    x: [B, F]; weight: [1, F] (PyTorch nn.Linear layout); bias: [1].
    Returns [B, 1] in x.dtype. x is streamed in its native dtype with no
    wrapper-side pad / cast copies.
    """
    B, F = x.shape
    out_dtype = x.dtype

    # Reduction tile: a multiple of 128 (<= F), or exactly F (single step).
    if tk >= F:
        tk = F
    else:
        tk = max(128, (tk // 128) * 128)

    # Batch tile: multiple of 8 (f32 sublane tile), or exactly B when tiny.
    # Cap so there are >=2 batch blocks whenever possible (v7x has 2 TCs and the
    # batch axis is the "parallel" one).
    if B < 16:
        tm = B
    else:
        tm = min(tm, max(8, ((B // 2) // 8) * 8))
        tm = max(8, (tm // 8) * 8)

    assert tk % 128 == 0 or tk == F
    grid = (pl.cdiv(B, tm), pl.cdiv(F, tk))

    w_row = weight.reshape(1, F)                    # lane-dense weight row
    b_sc = bias.reshape(1).astype(jnp.float32)      # SMEM scalar

    kernel = functools.partial(_svm_kernel, n_features=F, block_k=tk)

    return pl.pallas_call(
        kernel,
        out_shape=jax.ShapeDtypeStruct((B, 1), out_dtype),
        grid_spec=pltpu.PrefetchScalarGridSpec(
            num_scalar_prefetch=0,
            grid=grid,
            in_specs=[
                pl.BlockSpec((tm, tk), lambda i, k: (i, k)),
                pl.BlockSpec((1, tk), lambda i, k: (0, k)),
                pl.BlockSpec(memory_space=pltpu.MemorySpace.SMEM),
            ],
            out_specs=pl.BlockSpec((tm, 1), lambda i, k: (i, 0)),
            scratch_shapes=[pltpu.VMEM((tm, 128), jnp.float32)],
        ),
        compiler_params=pltpu.CompilerParams(
            dimension_semantics=("parallel", "arbitrary"),
            vmem_limit_bytes=48 * 1024 * 1024,
        ),
    )(x, w_row, b_sc)


if __name__ == "__main__":
    key = jax.random.PRNGKey(0)
    kx, kw, kb = jax.random.split(key, 3)

    # Deliberately non-tile-aligned shapes to exercise ragged batch rows
    # (dropped OOB output writes) and the masked ragged feature edge.
    batch, n_features = 20, 300

    x = jax.random.normal(kx, (batch, n_features), dtype=jnp.float32)
    # Mimics nn.Linear's uniform(-1/sqrt(F), 1/sqrt(F)) init.
    bound = 1.0 / float(n_features) ** 0.5
    weight = jax.random.uniform(kw, (1, n_features), jnp.float32, -bound, bound)
    bias = jax.random.uniform(kb, (1,), jnp.float32, -bound, bound)

    ref = x @ weight.T + bias

    # Small explicit tiles: multi-block grid on both axes (ragged edges, fold path).
    out_small = jax.block_until_ready(svm_forward(x, weight, bias, tm=8, tk=128))
    # Default tiles: clamps to tk == F (single reduction step, direct-reduce path).
    out_default = jax.block_until_ready(svm_forward(x, weight, bias))

    assert out_small.shape == (batch, 1)
    assert out_default.shape == (batch, 1)
    assert jnp.allclose(out_small, ref, atol=1e-3, rtol=1e-3), float(
        jnp.max(jnp.abs(out_small - ref)))
    assert jnp.allclose(out_default, ref, atol=1e-3, rtol=1e-3), float(
        jnp.max(jnp.abs(out_default - ref)))

    print("KERNEL_OK")
</pallas_src>

<mosaic_0001>
module attributes {stable_mosaic.version = 11 : i64} {
  func.func @_svm_kernel(%arg0: i32, %arg1: i32, %arg2: memref<8x128xf32, #tpu.memory_space<vmem>>, %arg3: memref<1x128xf32, #tpu.memory_space<vmem>>, %arg4: memref<1xf32, #tpu.memory_space<smem>>, %arg5: memref<8x1xf32, #tpu.memory_space<vmem>>, %arg6: memref<8x128xf32, #tpu.memory_space<vmem>>) attributes {dimension_semantics = [#tpu.dimension_semantics<parallel>, #tpu.dimension_semantics<arbitrary>], iteration_bounds = array<i64: 3, 3>, scalar_prefetch = 0 : i64, scratch_operands = 1 : i64, tpu.core_type = #tpu.core_type<tc>, window_params = [{transform_indices = @transform_0, window_bounds = array<i64: 8, 128>}, {transform_indices = @transform_1, window_bounds = array<i64: 1, 128>}, {transform_indices = @transform_2, window_bounds = array<i64: 1>}, {transform_indices = @transform_3, window_bounds = array<i64: 8, 1>}]} {
    %c0 = arith.constant 0 : index
    %c0_0 = arith.constant 0 : index
    %0 = vector.load %arg2[%c0, %c0_0] : memref<8x128xf32, #tpu.memory_space<vmem>>, vector<8x128xf32>
    %c0_1 = arith.constant 0 : index
    %c0_2 = arith.constant 0 : index
    %1 = vector.load %arg3[%c0_1, %c0_2] : memref<1x128xf32, #tpu.memory_space<vmem>>, vector<1x128xf32>
    %2 = vector.broadcast %1 : vector<1x128xf32> to vector<8x128xf32>
    %3 = arith.mulf %0, %2 : vector<8x128xf32>
    %c128_i32 = arith.constant 128 : i32
    %4 = arith.muli %arg1, %c128_i32 : i32
    %5 = tpu.iota {dimensions = array<i32: 1>} : vector<8x128xi32>
    %6 = vector.broadcast %4 : i32 to vector<8x128xi32>
    %7 = arith.addi %6, %5 : vector<8x128xi32>
    %c300_i32 = arith.constant 300 : i32
    %8 = vector.broadcast %c300_i32 : i32 to vector<8x128xi32>
    %9 = arith.cmpi slt, %7, %8 : vector<8x128xi32>
    %cst = arith.constant 0.000000e+00 : f32
    %10 = vector.broadcast %cst : f32 to vector<8x128xf32>
    %11 = arith.select %9, %3, %10 : vector<8x128xi1>, vector<8x128xf32>
    %c0_i32 = arith.constant 0 : i32
    %12 = arith.cmpi eq, %arg1, %c0_i32 : i32
    %13 = arith.extui %12 : i1 to i32
    %c0_i32_3 = arith.constant 0 : i32
    %14 = arith.cmpi ne, %13, %c0_i32_3 : i32
    scf.if %14 {
      %cst_9 = arith.constant 0.000000e+00 : f32
      %21 = vector.broadcast %cst_9 : f32 to vector<8x128xf32>
      %c0_10 = arith.constant 0 : index
      %c0_11 = arith.constant 0 : index
      %22 = vector.load %arg6[%c0_10, %c0_11] : memref<8x128xf32, #tpu.memory_space<vmem>>, vector<8x128xf32>
      tpu.vector_store %arg6[%c0_10, %c0_11], %21 {strides = array<i32>} : memref<8x128xf32, #tpu.memory_space<vmem>>, vector<8x128xf32>,
    } else {
    }
    %c0_4 = arith.constant 0 : index
    %c0_5 = arith.constant 0 : index
    %15 = vector.load %arg6[%c0_4, %c0_5] : memref<8x128xf32, #tpu.memory_space<vmem>>, vector<8x128xf32>
    %16 = arith.addf %15, %11 : vector<8x128xf32>
    %c0_6 = arith.constant 0 : index
    %c0_7 = arith.constant 0 : index
    %17 = vector.load %arg6[%c0_6, %c0_7] : memref<8x128xf32, #tpu.memory_space<vmem>>, vector<8x128xf32>
    tpu.vector_store %arg6[%c0_6, %c0_7], %16 {strides = array<i32>} : memref<8x128xf32, #tpu.memory_space<vmem>>, vector<8x128xf32>,
    %c2_i32 = arith.constant 2 : i32
    %18 = arith.cmpi eq, %arg1, %c2_i32 : i32
    %19 = arith.extui %18 : i1 to i32
    %c0_i32_8 = arith.constant 0 : i32
    %20 = arith.cmpi ne, %19, %c0_i32_8 : i32
    scf.if %20 {
      %c0_9 = arith.constant 0 : index
      %c0_10 = arith.constant 0 : index
      %21 = vector.load %arg6[%c0_9, %c0_10] : memref<8x128xf32, #tpu.memory_space<vmem>>, vector<8x128xf32>
      %cst_11 = arith.constant dense<0.000000e+00> : vector<8xf32>
      %22 = vector.multi_reduction <add>, %21, %cst_11 [1] : vector<8x128xf32> to vector<8xf32>
      %23 = vector.shape_cast %22 : vector<8xf32> to vector<8x1xf32>
      %c0_12 = arith.constant 0 : index
      %24 = memref.load %arg4[%c0_12] : memref<1xf32, #tpu.memory_space<smem>>
      %25 = vector.broadcast %24 : f32 to vector<8x1xf32>
      %26 = arith.addf %23, %25 : vector<8x1xf32>
      %c0_13 = arith.constant 0 : index
      %c0_14 = arith.constant 0 : index
      %27 = vector.load %arg5[%c0_13, %c0_14] : memref<8x1xf32, #tpu.memory_space<vmem>>, vector<8x1xf32>
      tpu.vector_store %arg5[%c0_13, %c0_14], %26 {strides = array<i32>} : memref<8x1xf32, #tpu.memory_space<vmem>>, vector<8x1xf32>,
    } else {
    }
    return
  }
  func.func @transform_0(%arg0: i32, %arg1: i32) -> (i32, i32) {
    %c0_i32 = arith.constant 0 : i32
    return %arg0, %arg1 : i32, i32
  }
  func.func @transform_1(%arg0: i32, %arg1: i32) -> (i32, i32) {
    %c0_i32 = arith.constant 0 : i32
    %c0_i32_0 = arith.constant 0 : i32
    return %c0_i32, %arg1 : i32, i32
  }
  func.func @transform_2(%arg0: i32, %arg1: i32) -> i32 {
    %c0_i32 = arith.constant 0 : i32
    %c0_i32_0 = arith.constant 0 : i32
    return %c0_i32 : i32
  }
  func.func @transform_3(%arg0: i32, %arg1: i32) -> (i32, i32) {
    %c0_i32 = arith.constant 0 : i32
    %c0_i32_0 = arith.constant 0 : i32
    return %arg0, %c0_i32 : i32, i32
  }
}

</mosaic_0001>

<bundles_post_ra>
// kernel: tpu_custom_call.1
= control target key start
LH: loop header
LB: loop body
LE: loop exit
PB: predicated region body
PF: predicated region fallthrough
CT: control target
= control target key end

     0   :  { %s682_s0 = inlined_call_operand.hbm [shape: f32[20,300], index: 0, kind: input, shape index: {}]   ;;  %s683_s1 = inlined_call_operand.vmem [shape: f32[1,300], index: 1, kind: input, shape index: {}]   ;;  %s684_s2 = inlined_call_operand.<no memory space> [shape: f32[1], index: 2, kind: input, shape index: {}]   ;;  %s685_s3 = inlined_call_operand.vmem [shape: f32[20,1], index: 3, kind: output, shape index: {}]  }
   0x1   :  { %8 = sst [smem:[#allocation3]] %s684_s2 }
   0x2   :  { %9 = vsyncpa [#allocation5], 0 }
   0x3   :  { %11 = vsyncpa [#allocation5 + $0x1], 0  ;;  %s549_s14 = smov 0   ;;  %s551_s15 = smov 0  }
   0x4   :  { %s553_s16 = smov 0   ;;  %s555_s17 = smov 0  }
   0x5   :  { %s557_s18 = smov 0   ;;  %s559_s19 = smov 0  }
   0x6   :  { %s561_s20 = smov 0   ;;  %s563_s21 = smov 0  }
   0x7 LB: > { %s340_s2 = sadd.s32 4294967295, %s522_s21   ;;  %s26_s22 = sadd.s32 1, %s514_s19  ;;  %s522_s21 = sphi %s563_s21, %s17_s21   ;;  %s518_s20 = sphi %s561_s20, %s695_s20   ;;  %s514_s19 = sphi %s559_s19, %s694_s19   ;;  %s510_s18 = sphi %s557_s18, %s693_s18   ;;  %s506_s17 = sphi %s555_s17, %s692_s17   ;;  %s502_s16 = sphi %s553_s16, %s691_s16   ;;  %s498_s15 = sphi %s551_s15, %s690_s15   ;;  %s494_s14 = sphi %s549_s14, %s689_s14  }
   0x8   : > { %p27_p0 = scmp.ge.s32.totalorder %s26_s22, 3  ;;  %s29_s23 = sadd.s32 1, %s518_s20 }
   0x9   : > { %s38_s24 = sadd.s32 1, %s502_s16  ;;  %p45_p1 = scmp.ne.s32.totalorder %s502_s16, %s498_s15 }
   0xa   : > { %s697_s22 = smov (%p27_p0, %s26_s22), 0  ;;  %s699_s23 = smov (!%p27_p0, %s29_s23), %s518_s20 }
   0xb   : > { %s34_s25 = ssub.s32 %s514_s19, %s697_s22  ;;  %p46_p2 = scmp.eq.s32.totalorder %s522_s21, 0 }
   0xc   : > { %p31_p3 = scmp.ge.s32.totalorder %s699_s23, 3  ;;  %p51_p4 = scmp.ne.s32.totalorder %s498_s15, %s494_s14 }
   0xd   : > { %p600_p5 = por %p46_p2, %p45_p1  ;;  %p52_p6 = scmp.eq.s32.totalorder %s340_s2, 0 }
   0xe   : > { %s701_s23 = smov (%p31_p3, %s699_s23), 0  ;;  %p362_p8 = scmp.lt.s32.totalorder %s522_s21, 9 }
   0xf   : > { %p606_p7 = por %p52_p6, %p51_p4  ;;  %s33_s28 = ssub.s32 %s518_s20, %s701_s23 }
  0x10   : > { %s35_s29 = sor.u32 %s34_s25, %s33_s28  ;;  %s151_s30 = sand.u32 1, %s502_s16  }
  0x11   : > { %p36_p9 = scmp.eq.s32.totalorder %s35_s29, 0  ;;  %s344_s4 = sshll.u32 %s151_s30, 3 }
  0x12   : > { %s355_s5 = smul.u32 3, %s518_s20  ;;  %s155_s9 = scalar_lea.vmem [#allocation4], %s344_s4 }
  0x13   : > { %s616_s6 = scalar_select %p36_p9, %s502_s16, %s38_s24  }
  0x14   : > { %s160_s7 = sadd.s32 %s514_s19, %s355_s5  ;;  %s164_s10 = sshll.u32 %s155_s9, 4  ;;  %s165_s10 = int_to_ptr.vmem [resolvable:$true] %s164_s10 }
  0x15   : > { %s345_s8 = sshll.u32 %s160_s7, 7  ;;  %p626_p10 = pnand %p362_p8, %p600_p5 }
  0x16   : > { %s162_s13 = scalar_lea.hbm %s682_s0, %s345_s8  ;;  %p346_p11 = scmp.ge.s32.totalorder %s522_s21, 1 }
  0x17   : > { %p175_p12 = scmp.lt.s32.totalorder %s522_s21, 10  ;;  %s152_s2 = scalar_lea.sflag [#allocation5], %s151_s30 }
  0x18   : > { %p430_p13 = pneg %p626_p10  ;;  %s441_s24 = scalar_lea.vmem %s165_s10, 128 }
  0x19   : > { %p442_p0 = scmp.ne.s32.totalorder %s165_s10, %s441_s24  ;;  %s524_s25 = smov [#allocation4]  }
  0x1a   : > { %s446_s28 = sshll.u32 %s524_s25, 4  ;;  %s447_s28 = int_to_ptr.vmem [resolvable:$false] %s446_s28 }
  0x1b   : > { %p444_p1 = pnand %p442_p0, %p430_p13  ;;  %s448_s29 = scalar_lea.vmem %s447_s28, 256 }
  0x1c   : > { %p449_p3 = scmp.lt.s32.totalorder %s165_s10, %s447_s28  ;;  %p450_p4 = scmp.lt.s32.totalorder %s448_s29, %s441_s24 }
  0x1d   : > { %p445_p2 = pneg %p444_p1 }
  0x1e   : > { %p451_p5 = por %p450_p4, %p449_p3 }
  0x20   : > { %p452_p6 = pnand %p451_p5, %p445_p2 }
  0x22   : > { %455 = shalt.err (!%p452_p6)
}
  0x23   : > { %361 = dma.hbm_to_vmem [thread:$0]  (!%p626_p10), %s162_s13, 128, %s165_s10, %s152_s2  }
  0x24   : > { %p176_p8 = pnand %p346_p11, %p175_p12 }
  0x25   : > { %s181_s26 = sand.u32 (!%p176_p8), 1, %s498_s15  }
  0x26   : > { %179 = sbr.rel (%p176_p8) target bundleno = 214 (0xd6), region = 32  ;;  %s347_s30 = sshll.u32 (!%p176_p8), %s181_s26, 3 }
  0x27   : > { %s182_s4 = scalar_lea.sflag (!%p176_p8), [#allocation5], %s181_s26  ;;  %s185_s5 = scalar_lea.vmem (!%p176_p8), [#allocation4], %s347_s30 }
  0x2b   : > { %489 = dma.done.wait (%p606_p7), %s182_s4, 128  }
  0x2c   : > { %491 = vsyncadd (%p606_p7), %s182_s4, 4294967168  ;;  %p210_p9 = scmp.lt.s32.totalorder %s506_s17, 2  ;;  %s350_s7 = sshll.u32 %s506_s17, 7  ;;  %v227_v0 = vlaneseq  ;;  %v217_v4 = vld [vmem:[%s185_s5] sm:$0xff] }
  0x2d   : > { %v229_v1 = vstv %s350_s7  ;;  %p213_p10 = scmp.lt.s32.totalorder %s510_s18, 2  ;;  %p351_p7 = scmp.ne.s32.totalorder %s506_s17, 0 }
  0x2e   : > { %s211_s8 = scalar_select %p210_p9, %s506_s17, 2  ;;  %v228_v2 = vand.u32 127, %v227_v0 }
  0x2f   : > { %s703_s18 = smov (!%p213_p10, %s510_s18), 2 }
  0x30   : > { %s212_s11 = scalar_lea.vmem %s683_s1, %s211_s8  ;;  %v230_v3 = vadd.s32 %v229_v1, %v228_v2  ;;  %s348_s27 = sshll.u32 %s703_s18, 3 }
  0x31   : > { %s216_s14 = scalar_lea.vmem %s685_s3, %s348_s27  ;;  %v349_v5 = vld [vmem:[%s212_s11] ss:$0 sm:$0xff]  ;;  %236 = sbr.rel (%p351_p7) target bundleno = 56 (0x38), region = 40 }
  0x32   : > { %vm231_vm0 = vcmp.lt.s32.totalorder %v230_v3, 300  ;;  %v225_v6 = vmul.f32 %v349_v5, %v217_v4 }
  0x34   : > { %v232_v7 = vsel %vm231_vm0, %v225_v6, 0.0 }
  0x36   : > { %v525_v8 = vmov 0.0  }
  0x37   : > { %237 = vst [vmem:[#allocation2] sm:$0xff] %v525_v8 }
  0x38 PF: > { %p352_p11 = scmp.ne.s32.totalorder %s506_s17, 2 }
  0x39   : > { %s248_s18 = sld [smem:[#allocation3]] (!%p352_p11) }
  0x3d   : > { %244 = sbr.rel (%p352_p11) target bundleno = 214 (0xd6), region = 44 }
  0x3e   : > { %v238_v9 = vld [vmem:[#allocation2] sm:$0xff] }
  0x3f   : > { %v239_v10 = vadd.f32 %v238_v9, %v232_v7 }
  0x41   : > { %240 = vst [vmem:[#allocation2] sm:$0xff] %v239_v10 }
  0x42   : > { %v249_v12 = vstv %s248_s18  ;;  %vm251_vm1 = vcmask 7168  }
  0x48   : > { %v245_v11 = vld [vmem:[#allocation2] sm:$0xff] }
  0x49   : > { %246 = vadd.xlane.f32.xlu0 %v245_v11 }
  0xd2   : > { %v247_v13 = vpop.xlane.xlu0 %246 }
  0xd3   : > { %v250_v14 = vadd.f32 %v249_v12, %v247_v13 }
  0xd5   : > { %252 = vst.msk [vmem:[%s216_s14] sm:$0xff] %vm251_vm1, %v250_v14 }
  0xd6 PF: > { %s17_s21 = sadd.s32 1, %s522_s21   ;;  %s689_s14 = smov %s498_s15 }
  0xd7   : > { %p14_p12 = scmp.ge.s32.totalorder %s17_s21, 11   ;;  %s690_s15 = smov %s502_s16 }
  0xd8   : > { %s691_s16 = smov %s616_s6  ;;  %s692_s17 = smov %s514_s19 }
  0xd9   : > { %s693_s18 = smov %s518_s20  ;;  %s694_s19 = smov %s697_s22 }
  0xda   : > { %s695_s20 = smov %s701_s23  ;;  %16 = sbr.rel (!%p14_p12) target bundleno = 7 (0x7), region = 83 }
  0xdf   :  { %272 = vsyncpa [#allocation5], 1 }
  0xe0   :  { %274 = vsyncpa [#allocation5 + $0x1], 1 }

</bundles_post_ra>
